<compile_context>
chip_gen: v7x
topology: tpu7x:2x2x1
jax: 0.10.0
libtpu: 0.0.40
codegen_flags: <defaults>
</compile_context>

<pallas_src>
import numpy as np
import jax
import jax.numpy as jnp
from jax.experimental import pallas as pl
from jax.experimental.pallas import tpu as pltpu


# ----------------------------------------------------------------------------
# Layout planning
# ----------------------------------------------------------------------------
_MAX_IMG_BLOCK_BYTES = 1 << 20   # 1 MiB per (1, TR, lanes) block: ~7 live blocks
                                 # per step fit v5e's 16 MiB / v7x's 32 MiB
                                 # default scoped VMEM with headroom, while
                                 # staying >= the ~0.5-1 MiB needed for ~85% of
                                 # the HBM roofline.
_MAX_LBL_BLOCK_BYTES = 8 << 20   # cap for the double-buffered (TI,1,B,Kp) output.


def _round_up(a, m):
    return -(-a // m) * m


def _plan_image_layout(n, itemsize, max_block_bytes=_MAX_IMG_BLOCK_BYTES):
    """Lay a per-example payload of `n` elements out as (rows, lanes).

    lanes % 128 == 0 always; prefer the widest lane dim whose implied sublane
    padding (to the dtype-native 8/16/32 sublane tile) wastes <= 5%, so vregs
    stay packed and stores are unmasked + lane-dense.  If one per-example block
    is too large for VMEM, tile the row axis with TR a multiple of the sublane
    tile (rows padded up so TR divides them).

    Returns (n_padded, rows, lanes, tr).
    """
    sub = max(8, 8 * (4 // max(1, itemsize)))        # 8 f32, 16 bf16, 32 int8
    n128 = _round_up(n, 128)
    best_key, best = None, None
    for lanes in (2048, 1024, 512, 256, 128):
        if n128 % lanes:
            continue
        rows = n128 // lanes
        waste = (_round_up(rows, sub) * lanes - n) / n
        key = (waste > 0.05, waste if waste > 0.05 else 0.0, -lanes)
        if best_key is None or key < best_key:
            best_key, best = key, (rows, lanes)
    rows, lanes = best
    if rows * lanes * itemsize <= max_block_bytes:
        tr = rows          # block covers the full row axis (legal even if rows % 8 != 0)
    else:
        tr = max(sub, (max_block_bytes // (lanes * itemsize)) // sub * sub)
        rows = _round_up(rows, tr)
    return rows * lanes, rows, lanes, tr


def _choose_label_group(B, Kp, out_itemsize, budget=_MAX_LBL_BLOCK_BYTES):
    """Largest TI in {8,4,2,1} that divides B and keeps the double-buffered
    (TI,1,B,Kp) output block under the VMEM budget (v5e-safe)."""
    for ti in (8, 4, 2):
        if B % ti == 0 and 2 * ti * B * Kp * out_itemsize <= budget:
            return ti
    return 1


# ----------------------------------------------------------------------------
# Kernels
# ----------------------------------------------------------------------------
def _mix_x_kernel(perm_ref, lam_ref, x_ref, xperm_ref, o_ref):
    """o[b, r] = x[b, r] + lam[b] * (x[perm[b], r] - x[b, r]).

    perm_ref : (B,) int32 scalar-prefetch (SMEM); consumed only by index_maps.
    lam_ref  : (B,)  f32 in SMEM (scalar read + splat; no VMEM tile padding).
    x_ref    : (1, TR, lanes) block of the un-permuted batch.
    xperm_ref: (1, TR, lanes) block of the permuted batch (gathered index_map).
    """
    del perm_ref  # used only by the index_maps
    b = pl.program_id(0)
    lam = lam_ref[b]                                   # f32 scalar from SMEM
    x = x_ref[...]
    o_ref[...] = (x + lam * (xperm_ref[...] - x)).astype(o_ref.dtype)


def _make_mix_y_kernel(ti):
    def _mix_y_kernel(lam_ref, my_ref, myp_ref, o_ref):
        """o[i*ti+t, 0] = my + lam[i*ti+t] * (my_perm - my), t in [0, ti).

        lam_ref : (B,)   f32 in SMEM.
        my_ref  : (B,Kp) f32 smoothed one-hots, VMEM resident.
        myp_ref : (B,Kp) f32 permuted smoothed one-hots, VMEM resident.
        o_ref   : (ti, 1, B, Kp) block of the (B, 1, B, Kp) broadcast output
                  (the exact broadcasting quirk of the PyTorch reference).
        """
        i = pl.program_id(0)
        my = my_ref[...]
        delta = myp_ref[...] - my                      # hoisted once per step
        for t in range(ti):                            # static unroll, ti <= 8
            lam = lam_ref[i * ti + t]
            o_ref[t, 0, :, :] = (my + lam * delta).astype(o_ref.dtype)
    return _mix_y_kernel


# ----------------------------------------------------------------------------
# Wrappers
# ----------------------------------------------------------------------------
def _mix_images(x, perm, lam):
    """x mixed with x[perm] using per-example lam. NCHW in/out; internally
    (B, rows, lanes) with lanes % 128 == 0 and (padded) full-vreg row packing."""
    B = x.shape[0]
    n = int(np.prod(x.shape[1:]))
    n_pad, rows, lanes, tr = _plan_image_layout(n, x.dtype.itemsize)

    xf = x.reshape(B, n)
    if n_pad != n:
        xf = jnp.pad(xf, ((0, 0), (0, n_pad - n)))     # zero-pad, sliced back below
    x3 = xf.reshape(B, rows, lanes)
    lam_f32 = lam.reshape(B).astype(jnp.float32)

    grid = (B, rows // tr)

    def build(extra_gather_buffering):
        gather_kwargs = {}
        if extra_gather_buffering:
            # The gathered block lands at a random HBM offset each step, so its
            # DMA issue latency is not amortized like the sequential stream; a
            # third buffer hides one extra step (helps most on v6e/v7x).
            gather_kwargs["pipeline_mode"] = pl.Buffered(3)
        return pl.pallas_call(
            _mix_x_kernel,
            out_shape=jax.ShapeDtypeStruct((B, rows, lanes), x.dtype),
            grid_spec=pltpu.PrefetchScalarGridSpec(
                num_scalar_prefetch=1,                 # perm lands in SMEM
                grid=grid,
                in_specs=[
                    # lam: whole (B,) vector in SMEM (no per-step DMA, no
                    # (8,128) tile padding).
                    pl.BlockSpec(memory_space=pltpu.MemorySpace.SMEM),
                    # x[b]
                    pl.BlockSpec((1, tr, lanes), lambda b, r, perm: (b, r, 0)),
                    # x[perm[b]] -- gathered via scalar-prefetch index_map.
                    pl.BlockSpec((1, tr, lanes), lambda b, r, perm: (perm[b], r, 0),
                                 **gather_kwargs),
                ],
                out_specs=pl.BlockSpec((1, tr, lanes), lambda b, r, perm: (b, r, 0)),
            ),
            # Each output block is written exactly once -> both axes truly
            # parallel (v7x megacore sharding); blocks are <= 1 MiB so the
            # default scoped-VMEM budget is ample on every generation.
            compiler_params=pltpu.CompilerParams(
                dimension_semantics=("parallel", "parallel")),
        )

    try:
        out = build(True)(perm, lam_f32, x3, x3)
    except Exception:
        # pipeline_mode / pl.Buffered not supported on this jax build ->
        # fall back to default double buffering (correct, slightly less overlap).
        out = build(False)(perm, lam_f32, x3, x3)

    return out.reshape(B, n_pad)[:, :n].reshape(x.shape)


def _mix_labels(my, my_perm, lam, out_dtype):
    """Mixes smoothed labels, reproducing the reference's (B,1,B,K) broadcast.
    Class dim is padded to a multiple of 128 for lane-dense stores; TI lam rows
    are grouped per grid step to amortize grid-step overhead."""
    B, K = my.shape
    Kp = _round_up(K, 128)
    if Kp != K:
        my = jnp.pad(my, ((0, 0), (0, Kp - K)))
        my_perm = jnp.pad(my_perm, ((0, 0), (0, Kp - K)))
    lam_f32 = lam.reshape(B).astype(jnp.float32)
    ti = _choose_label_group(B, Kp, jnp.dtype(out_dtype).itemsize)

    out = pl.pallas_call(
        _make_mix_y_kernel(ti),
        out_shape=jax.ShapeDtypeStruct((B, 1, B, Kp), out_dtype),
        grid_spec=pltpu.PrefetchScalarGridSpec(
            num_scalar_prefetch=0,
            grid=(B // ti,),                           # TI lam rows per step
            in_specs=[
                pl.BlockSpec(memory_space=pltpu.MemorySpace.SMEM),  # lam (B,)
                pl.BlockSpec((B, Kp), lambda i: (0, 0)),            # my, resident
                pl.BlockSpec((B, Kp), lambda i: (0, 0)),            # my[perm], resident
            ],
            out_specs=pl.BlockSpec((ti, 1, B, Kp), lambda i: (i, 0, 0, 0)),
        ),
        compiler_params=pltpu.CompilerParams(
            dimension_semantics=("parallel",)),
    )(lam_f32, my, my_perm)

    if Kp != K:
        out = out[..., :K]
    return out


def mixup_pallas(x, y, num_classes, gamma, smooth_eps, key):
    """Functional equivalent of `mixup(x, y, num_classes, gamma, smooth_eps)`."""
    if gamma == 0 and smooth_eps == 0:
        return x, y

    true_class = 1.0 - smooth_eps * num_classes / (num_classes - 1)
    false_class = smooth_eps / (num_classes - 1)

    # Smoothed one-hot labels, built once in f32 (O(B*K), trivial vs. the mix).
    cls = jnp.arange(num_classes, dtype=jnp.int32)[None, :]
    my = (cls == y[:, None].astype(jnp.int32)).astype(jnp.float32)
    my = my * true_class + false_class

    if gamma == 0:
        return x, my.astype(x.dtype)

    B = x.shape[0]
    kp, kl = jax.random.split(key)
    # TODO(synk): randperm / Beta sampling done host-side with jax.random.
    perm = jax.random.permutation(kp, B).astype(jnp.int32)
    lam = jax.random.beta(kl, gamma, gamma, (B,)).astype(jnp.float32)

    x_mixed = _mix_images(x, perm, lam)
    y_mixed = _mix_labels(my, my[perm], lam, x.dtype)
    return x_mixed, y_mixed


class MixupScheduledPallas:
    """Stateful scheduler mirroring MixupScheduled.__init__ / step / forward."""

    def __init__(self, start_gamma, stop_gamma, wait_steps, nr_steps, start_step,
                 num_classes=1000, smooth_eps=0):
        self.num_classes = num_classes
        self.gamma = start_gamma
        self.smooth_eps = smooth_eps
        self.wait_steps = wait_steps
        self.i = start_step
        self.gamma_values = np.linspace(start=start_gamma, stop=stop_gamma,
                                        num=nr_steps)

    def step(self):
        curr = self.i - self.wait_steps
        if curr > 0 and curr < len(self.gamma_values):
            self.gamma = self.gamma_values[curr]
        self.i += 1

    def __call__(self, inp, target, key):
        self.step()
        return mixup_pallas(inp, target, self.num_classes,
                            float(self.gamma), float(self.smooth_eps), key)


# ----------------------------------------------------------------------------
# Demo
# ----------------------------------------------------------------------------
if __name__ == "__main__":
    key = jax.random.PRNGKey(0)
    kx, ky, kmix = jax.random.split(key, 3)

    B, C, H, W = 2, 4, 16, 16
    num_classes = 16
    smooth_eps = 0.1

    x = jax.random.normal(kx, (B, C, H, W), dtype=jnp.float32)   # NCHW
    y = jax.random.randint(ky, (B,), 0, num_classes, dtype=jnp.int32)

    module = MixupScheduledPallas(
        start_gamma=0.2, stop_gamma=1.0, wait_steps=0, nr_steps=10,
        start_step=5, num_classes=num_classes, smooth_eps=smooth_eps)

    x_mixed, y_mixed = module(x, y, kmix)
    jax.block_until_ready((x_mixed, y_mixed))

    assert x_mixed.shape == (B, C, H, W)
    assert y_mixed.shape == (B, 1, B, num_classes)   # PyTorch broadcast quirk

    # Pure-JAX reference with the same RNG draws.
    kp, kl = jax.random.split(kmix)
    perm = jax.random.permutation(kp, B).astype(jnp.int32)
    gamma = float(module.gamma)
    lam = jax.random.beta(kl, gamma, gamma, (B,)).astype(jnp.float32)
    true_c = 1.0 - smooth_eps * num_classes / (num_classes - 1)
    false_c = smooth_eps / (num_classes - 1)
    my_ref = (jnp.arange(num_classes)[None, :] == y[:, None]).astype(jnp.float32)
    my_ref = my_ref * true_c + false_c
    lam4 = lam.reshape(B, 1, 1, 1)
    x_ref = x * (1.0 - lam4) + x[perm] * lam4
    y_ref = (my_ref * (1.0 - lam4) + my_ref[perm] * lam4).astype(x.dtype)

    assert jnp.allclose(x_mixed, x_ref, atol=1e-5, rtol=1e-5)
    assert jnp.allclose(y_mixed, y_ref, atol=1e-5, rtol=1e-5)
    print("KERNEL_OK")
</pallas_src>

<mosaic_0001>
module attributes {stable_mosaic.version = 11 : i64} {
  func.func @_mix_x_kernel(%arg0: i32, %arg1: i32, %arg2: memref<2xi32, #tpu.memory_space<smem>>, %arg3: memref<2xf32, #tpu.memory_space<smem>>, %arg4: memref<1x8x128xf32, #tpu.memory_space<vmem>>, %arg5: memref<1x8x128xf32, #tpu.memory_space<vmem>>, %arg6: memref<1x8x128xf32, #tpu.memory_space<vmem>>) attributes {dimension_semantics = [#tpu.dimension_semantics<parallel>, #tpu.dimension_semantics<parallel>], iteration_bounds = array<i64: 2, 1>, scalar_prefetch = 1 : i64, scratch_operands = 0 : i64, tpu.core_type = #tpu.core_type<tc>, window_params = [{transform_indices = @transform_0, window_bounds = array<i64: 2>}, {transform_indices = @transform_1, window_bounds = array<i64: 1, 8, 128>}, {transform_indices = @transform_2, window_bounds = array<i64: 1, 8, 128>}, {transform_indices = @transform_3, window_bounds = array<i64: 1, 8, 128>}]} {
    %0 = arith.index_cast %arg0 : i32 to index
    %1 = memref.load %arg3[%0] : memref<2xf32, #tpu.memory_space<smem>>
    %c0 = arith.constant 0 : index
    %c0_0 = arith.constant 0 : index
    %c0_1 = arith.constant 0 : index
    %2 = vector.load %arg4[%c0, %c0_0, %c0_1] : memref<1x8x128xf32, #tpu.memory_space<vmem>>, vector<1x8x128xf32>
    %c0_2 = arith.constant 0 : index
    %c0_3 = arith.constant 0 : index
    %c0_4 = arith.constant 0 : index
    %3 = vector.load %arg5[%c0_2, %c0_3, %c0_4] : memref<1x8x128xf32, #tpu.memory_space<vmem>>, vector<1x8x128xf32>
    %4 = arith.subf %3, %2 : vector<1x8x128xf32>
    %5 = vector.broadcast %1 : f32 to vector<1x8x128xf32>
    %6 = arith.mulf %5, %4 : vector<1x8x128xf32>
    %7 = arith.addf %2, %6 : vector<1x8x128xf32>
    %c0_5 = arith.constant 0 : index
    %c0_6 = arith.constant 0 : index
    %c0_7 = arith.constant 0 : index
    %8 = vector.load %arg6[%c0_5, %c0_6, %c0_7] : memref<1x8x128xf32, #tpu.memory_space<vmem>>, vector<1x8x128xf32>
    tpu.vector_store %arg6[%c0_5, %c0_6, %c0_7], %7 {strides = array<i32>} : memref<1x8x128xf32, #tpu.memory_space<vmem>>, vector<1x8x128xf32>,
    return
  }
  func.func @transform_0(%arg0: i32, %arg1: i32, %arg2: memref<2xi32, #tpu.memory_space<smem>>) -> i32 {
    %c0_i32 = arith.constant 0 : i32
    %c0_i32_0 = arith.constant 0 : i32
    return %c0_i32 : i32
  }
  func.func @transform_1(%arg0: i32, %arg1: i32, %arg2: memref<2xi32, #tpu.memory_space<smem>>) -> (i32, i32, i32) {
    %c0_i32 = arith.constant 0 : i32
    %c0_i32_0 = arith.constant 0 : i32
    return %arg0, %arg1, %c0_i32 : i32, i32, i32
  }
  func.func @transform_2(%arg0: i32, %arg1: i32, %arg2: memref<2xi32, #tpu.memory_space<smem>>) -> (i32, i32, i32) {
    %0 = arith.index_cast %arg0 : i32 to index
    %1 = memref.load %arg2[%0] : memref<2xi32, #tpu.memory_space<smem>>
    %c0_i32 = arith.constant 0 : i32
    %c0_i32_0 = arith.constant 0 : i32
    return %1, %arg1, %c0_i32 : i32, i32, i32
  }
  func.func @transform_3(%arg0: i32, %arg1: i32, %arg2: memref<2xi32, #tpu.memory_space<smem>>) -> (i32, i32, i32) {
    %c0_i32 = arith.constant 0 : i32
    %c0_i32_0 = arith.constant 0 : i32
    return %arg0, %arg1, %c0_i32 : i32, i32, i32
  }
}

</mosaic_0001>

<bundles_post_ra>
// kernel: tpu_custom_call.1
= control target key start
LH: loop header
LB: loop body
LE: loop exit
PB: predicated region body
PF: predicated region fallthrough
CT: control target
= control target key end

     0   :  { %s1071_s0 = inlined_call_operand.hbm [shape: s32[2], index: 0, kind: input, shape index: {}]   ;;  %s1072_s1 = inlined_call_operand.vmem [shape: f32[2], index: 1, kind: input, shape index: {}]   ;;  %s1073_s2 = inlined_call_operand.hbm [shape: f32[2,8,128], index: 2, kind: input, shape index: {}]   ;;  %s1074_s3 = inlined_call_operand.hbm [shape: f32[2,8,128], index: 3, kind: input, shape index: {}]   ;;  %s1075_s4 = inlined_call_operand.hbm [shape: f32[2,8,128], index: 4, kind: output, shape index: {}]  }
   0x1   :  { %1085 = sst [smem:[#allocation22_spill]] %s1072_s1  ;;  %s530_s17 = scalar_lea.hbm %s1071_s0, 16 }
   0x2   :  { %p531_p0 = scmp.ne.s32.totalorder %s1071_s0, %s530_s17  ;;  %p534_p1 = scmp.lt.u32.totalorder %s530_s17, %s1071_s0 }
   0x4   :  { %p536_p2 = pnand %p534_p1, %p531_p0 }
   0x6   :  { %539 = shalt.err (!%p536_p2)  }
   0x7   :  { %s733_s22 = smov [#allocation3]  }
   0x8   :  { %10 = dma.hbm_to_smem %s1071_s0, 16, %s733_s22, [#allocation2] }
   0x9   :  { %679 = dma.done.wait [#allocation2], 16 }
   0xa   :  { %680 = vsyncadd [#allocation2], 4294967280 }
   0xb   :  { %12 = sfence }
   0xc   :  { %13 = vsyncpa [#allocation7], 0 }
   0xd   :  { %14 = vsyncpa [#allocation5], 0 }
   0xe   :  { %16 = vsyncpa [#allocation5 + $0x1], 0 }
   0xf   :  { %17 = vsyncpa [#allocation10], 0 }
  0x10   :  { %19 = vsyncpa [#allocation10 + $0x1], 0 }
  0x11   :  { %20 = vsyncpa [#allocation6], 0 }
  0x12   :  { %22 = vsyncpa [#allocation6 + $0x1], 0  ;;  %s775_s25 = smov 0   ;;  %s777_s26 = smov 0  }
  0x13   :  { %s779_s27 = smov 0   ;;  %s781_s28 = smov 0  }
  0x14   :  { %s783_s29 = smov 0   ;;  %s785_s0 = smov 0  }
  0x15   :  { %s787_s30 = smov 0   ;;  %s789_s5 = smov 0  }
  0x16   :  { %s791_s6 = smov 0  }
  0x17 LB: > { %1086 = sst [smem:[#allocation19_spill]] %s719_s0  ;;  %s405_s7 = sadd.s32 4294967295, %s731_s6   ;;  %s731_s6 = sphi %s791_s6, %s28_s6   ;;  %s727_s5 = sphi %s789_s5, %s1119_s5   ;;  %s723_s30 = sphi %s787_s30, %s1118_s30   ;;  %s719_s0 = sphi %s785_s0, %s1111_s0   ;;  %s715_s29 = sphi %s783_s29, %s1117_s29   ;;  %s711_s28 = sphi %s781_s28, %s1116_s28   ;;  %s707_s27 = sphi %s779_s27, %s1115_s27   ;;  %s703_s26 = sphi %s777_s26, %s1114_s26   ;;  %s699_s25 = sphi %s775_s25, %s1113_s25  }
  0x18   : > { %p113_p3 = scmp.ne.s32.totalorder %s703_s26, %s699_s25  ;;  %p820_p4 = scmp.eq.s32.totalorder %s405_s7, 0 }
  0x19   : > { %p824_p5 = scmp.eq.s32.totalorder %s405_s7, 1  ;;  %p407_p6 = scmp.ge.s32.totalorder %s731_s6, 1 }
  0x1a   : > { %s1087_s8 = scalar_select %p820_p4, 1, 0 }
  0x1b   : > { %p152_p7 = scmp.lt.s32.totalorder %s731_s6, 3  ;;  %p832_p8 = por %p113_p3, %p820_p4 }
  0x1c   : > { %s1091_s1 = sld [smem:[#allocation22_spill]] }
  0x1d   : > { %s1089_s10 = scalar_select %p832_p8, 1, 0 }
  0x1e   : > { %p836_p9 = pnand %p407_p6, %p152_p7 }
  0x20   : > { %p435_p10 = pneg %p836_p9 }
  0x22   : > { %s165_s14 = sshll.u32 %s1091_s1, 4  ;;  %p436_p12 = pnand %p435_p10, %p820_p4  ;;  %s166_s14 = int_to_ptr.vmem [resolvable:$true] %s165_s14 }
  0x23   : > { %s540_s15 = scalar_lea.vmem %s166_s14, 16  ;;  %p548_p3 = scmp.lt.s32.totalorder %s166_s14, %s166_s14 }
  0x24   : > { %p541_p13 = scmp.ne.s32.totalorder %s166_s14, %s540_s15  ;;  %p542_p0 = pneg %p436_p12 }
  0x25   : > { %p549_p6 = scmp.lt.s32.totalorder %s540_s15, %s540_s15 }
  0x26   : > { %p543_p1 = pnand %p542_p0, %p541_p13 }
  0x27   : > { %p550_p7 = por %p549_p6, %p548_p3 }
  0x28   : > { %p544_p2 = pneg %p543_p1 }
  0x2a   : > { %p551_p8 = pnand %p550_p7, %p544_p2 }
  0x2c   : > { %554 = shalt.err (!%p551_p8)
}
  0x2d   : > { %s734_s16 = smov [#allocation4]   ;;  %s406_s17 = sadd.s32 4294967294, %s731_s6  }
  0x2e   : > { %438 = dma.vmem_to_smem (!%p436_p12), %s166_s14, 16, %s734_s16, [#allocation7]  }
  0x2f   : > { %s40_s18 = sadd.s32 1, %s727_s5  ;;  %s70_s19 = sadd.s32 1, %s719_s0 }
  0x30   : > { %p42_p8 = scmp.ge.s32.totalorder %s40_s18, 2  ;;  %p77_p10 = scmp.ne.s32.totalorder %s719_s0, %s715_s29 }
  0x31   : > { %p1080_p13 = scmp.eq.s32.totalorder %s731_s6, 0  ;;  %p83_p12 = scmp.ne.s32.totalorder %s715_s29, %s711_s28 }
  0x32   : > { %s1121_s18 = smov (%p42_p8, %s40_s18), 0  ;;  %s867_s22 = sld [smem:[#allocation3 + %s727_s5]] }
  0x33   : > { %1092 = sst [smem:[#allocation20_spill]] %s1121_s18  ;;  %p858_p0 = por %p1080_p13, %p77_p10 }
  0x34   : > { %s65_s21 = ssub.s32 %s727_s5, %s1121_s18  ;;  %p871_p2 = por %p820_p4, %p83_p12 }
  0x35   : > { %p68_p1 = scmp.eq.s32.totalorder %s65_s21, 0  ;;  %s876_s24 = sld [smem:[#allocation3 + %s1121_s18]] }
  0x36   : > { %s1094_s23 = scalar_select %p871_p2, 1, 0 }
  0x37   : > { %p880_p3 = por %p824_p5, %p77_p10  ;;  %p145_p6 = scmp.eq.s32.totalorder %s406_s17, 1 }
  0x38   : > { %s885_s7 = scalar_select %p68_p1, %s719_s0, %s70_s19  }
  0x39   : > { %s1095_s25 = scalar_select %p880_p3, 1, 0 }
  0x3a   : > { %1096 = sst [smem:[#allocation21_spill]] %s885_s7  ;;  %p1079_p7 = scmp.lt.s32.totalorder %s731_s6, 2 }
  0x3b   : > { %s176_s12 = sand.u32 1, %s719_s0   ;;  %s411_s13 = sshll.u32 %s727_s5, 7 }
  0x3c   : > { %p890_p8 = por %p145_p6, %p83_p12  ;;  %s410_s15 = sshll.u32 %s176_s12, 3 }
  0x3d   : > { %s897_s1 = scalar_lea.hbm %s1073_s2, %s411_s13  ;;  %p903_p5 = pnand %p1079_p7, %p858_p0 }
  0x3e   : > { %s1097_s14 = scalar_select %p890_p8, 1, 0 }
  0x3f   : > { %s180_s17 = scalar_lea.vmem [#allocation8], %s410_s15  ;;  %s177_s18 = scalar_lea.sflag [#allocation5], %s176_s12 }
  0x40   : > { %s188_s19 = sshll.u32 %s180_s17, 4  ;;  %s555_s16 = scalar_lea.hbm %s897_s1, 128  ;;  %s907_s19 = int_to_ptr.vmem [resolvable:$true] %s188_s19 }
  0x41   : > { %p556_p10 = scmp.ne.s32.totalorder %s897_s1, %s555_s16  ;;  %p557_p12 = pneg %p903_p5 }
  0x42   : > { %s560_s21 = scalar_lea.hbm %s1073_s2, 256  ;;  %p561_p0 = scmp.lt.u32.totalorder %s897_s1, %s1073_s2 }
  0x43   : > { %p558_p1 = pnand %p557_p12, %p556_p10  ;;  %p562_p11 = scmp.lt.u32.totalorder %s560_s21, %s555_s16 }
  0x44   : > { %p564_p13 = scmp.lt.u32.totalorder %s555_s16, %s897_s1 }
  0x45   : > { %p559_p6 = pneg %p558_p1  ;;  %p563_p7 = por %p562_p11, %p561_p0 }
  0x47   : > { %p565_p8 = por %p564_p13, %p563_p7 }
  0x49   : > { %p566_p3 = pnand %p565_p8, %p559_p6 }
  0x4b   : > { %569 = shalt.err (!%p566_p3)
}
  0x4c   : > { %s570_s12 = scalar_lea.vmem %s907_s19, 128  ;;  %s735_s15 = smov [#allocation8]  }
  0x4d   : > { %p571_p10 = scmp.ne.s32.totalorder %s907_s19, %s570_s12  ;;  %s575_s17 = sshll.u32 %s735_s15, 4  ;;  %s576_s17 = int_to_ptr.vmem [resolvable:$false] %s575_s17 }
  0x4e   : > { %s577_s0 = scalar_lea.vmem %s576_s17, 256  ;;  %p578_p4 = scmp.lt.s32.totalorder %s907_s19, %s576_s17 }
  0x4f   : > { %p573_p1 = pnand %p571_p10, %p557_p12  ;;  %p579_p11 = scmp.lt.s32.totalorder %s577_s0, %s570_s12 }
  0x51   : > { %p574_p2 = pneg %p573_p1  ;;  %p580_p0 = por %p579_p11, %p578_p4 }
  0x53   : > { %p581_p13 = pnand %p580_p0, %p574_p2 }
  0x55   : > { %584 = shalt.err (!%p581_p13)
}
  0x56   : > { %442 = dma.hbm_to_vmem [thread:$0]  (!%p903_p5), %s897_s1, 128, %s907_s19, %s177_s18  }
  0x57   : > { %s95_s7 = ssub.s32 %s867_s22, %s876_s24  ;;  %s100_s16 = sadd.s32 1, %s707_s27 }
  0x58   : > { %p98_p4 = scmp.eq.s32.totalorder %s95_s7, 0  ;;  %p107_p2 = scmp.ne.s32.totalorder %s707_s27, %s703_s26 }
  0x59   : > { %s195_s9 = sand.u32 1, %s707_s27   ;;  %p1099_p3 = scmp.eq.s32.totalorder %s731_s6, 0 }
  0x5a   : > { %s941_s20 = scalar_select %p98_p4, %s707_s27, %s100_s16  }
  0x5b   : > { %p109_p7 = por %p107_p2, %p1099_p3  ;;  %s412_s13 = sshll.u32 %s195_s9, 3 }
  0x5c   : > { %p1100_p8 = scmp.lt.s32.totalorder %s731_s6, 2  ;;  %s199_s18 = scalar_lea.vmem [#allocation9], %s412_s13 }
  0x5d   : > { %s426_s12 = scalar_select %p109_p7, [#allocation3], [#allocation12] }
  0x5e   : > { %p947_p12 = pnand %p1100_p8, %p109_p7  ;;  %p1102_p5 = pmov %p1100_p8 }
  0x5f   : > { %s427_s15 = scalar_select %p109_p7, %s727_s5, 0 }
  0x60   : > { %s1123_s12 = smov (!%p1102_p5, %s426_s12), [#allocation13]  ;;  %p1103_p6 = pmov %p1102_p5 }
  0x61   : > { %s208_s22 = sshll.u32 %s199_s18, 4  ;;  %s196_s7 = scalar_lea.sflag [#allocation10], %s195_s9  ;;  %s956_s22 = int_to_ptr.vmem [resolvable:$true] %s208_s22 }
  0x62   : > { %s1125_s15 = smov (!%p1103_p6, %s427_s15), 0  ;;  %p587_p1 = pneg %p947_p12 }
  0x63   : > { %s200_s1 = sld [smem:[%s1123_s12 + %s1125_s15]]  ;;  %s590_s15 = scalar_lea.hbm %s1074_s3, 256 }
  0x69   : > { %s413_s24 = sshll.u32 %s200_s1, 7 }
  0x6a   : > { %s961_s0 = scalar_lea.hbm %s1074_s3, %s413_s24 }
  0x6b   : > { %s585_s16 = scalar_lea.hbm %s961_s0, 128  ;;  %p591_p13 = scmp.lt.u32.totalorder %s961_s0, %s1074_s3 }
  0x6c   : > { %p586_p10 = scmp.ne.s32.totalorder %s961_s0, %s585_s16  ;;  %p592_p4 = scmp.lt.u32.totalorder %s590_s15, %s585_s16 }
  0x6d   : > { %p594_p3 = scmp.lt.u32.totalorder %s585_s16, %s961_s0 }
  0x6e   : > { %p588_p11 = pnand %p587_p1, %p586_p10  ;;  %p593_p2 = por %p592_p4, %p591_p13 }
  0x70   : > { %p589_p0 = pneg %p588_p11  ;;  %p595_p7 = por %p594_p3, %p593_p2 }
  0x72   : > { %p596_p8 = pnand %p595_p7, %p589_p0 }
  0x74   : > { %599 = shalt.err (!%p596_p8)
}
  0x75   : > { %s600_s9 = scalar_lea.vmem %s956_s22, 128  ;;  %s736_s24 = smov [#allocation9]  }
  0x76   : > { %p601_p5 = scmp.ne.s32.totalorder %s956_s22, %s600_s9  ;;  %s605_s19 = sshll.u32 %s736_s24, 4  ;;  %s606_s19 = int_to_ptr.vmem [resolvable:$false] %s605_s19 }
  0x77   : > { %s607_s17 = scalar_lea.vmem %s606_s19, 256  ;;  %p608_p11 = scmp.lt.s32.totalorder %s956_s22, %s606_s19 }
  0x78   : > { %p603_p6 = pnand %p601_p5, %p587_p1  ;;  %p609_p13 = scmp.lt.s32.totalorder %s607_s17, %s600_s9 }
  0x7a   : > { %p604_p10 = pneg %p603_p6  ;;  %p610_p4 = por %p609_p13, %p608_p11 }
  0x7c   : > { %p611_p2 = pnand %p610_p4, %p604_p10 }
  0x7e   : > { %614 = shalt.err (!%p611_p2)
}
  0x7f   : > { %447 = dma.hbm_to_vmem [thread:$0]  (!%p947_p12), %s961_s0, 128, %s956_s22, %s196_s7  }
  0x80   : > { %217 = sbr.rel (%p836_p9) target bundleno = 172 (0xac), region = 32  ;;  %p1104_p1 = scmp.ne.s32.totalorder (!%p836_p9), %s1087_s8, 0 }
  0x87   : > { %682 = dma.done.wait (%p1104_p1), [#allocation7], 16  }
  0x88   : > { %684 = vsyncadd (%p1104_p1), [#allocation7], 4294967280  ;;  %s995_s16 = sand.u32 1, %s715_s29   ;;  %p1105_p0 = scmp.ne.s32.totalorder %s1094_s23, 0 }
  0x89   : > { %s416_s13 = sshll.u32 %s995_s16, 3  ;;  %s224_s21 = scalar_lea.sflag [#allocation5], %s995_s16 }
  0x8a   : > { %s227_s12 = scalar_lea.vmem [#allocation8], %s416_s13 }
  0x8b   : > { %686 = dma.done.wait (%p1105_p0), %s224_s21, 128  }
  0x8c   : > { %688 = vsyncadd (%p1105_p0), %s224_s21, 4294967168  ;;  %s232_s11 = sand.u32 1, %s703_s26   ;;  %p1106_p9 = scmp.ne.s32.totalorder %s1089_s10, 0 }
  0x8d   : > { %s417_s22 = sshll.u32 %s232_s11, 3  ;;  %s233_s8 = scalar_lea.sflag [#allocation10], %s232_s11 }
  0x8e   : > { %s236_s0 = scalar_lea.vmem [#allocation9], %s417_s22 }
  0x8f   : > { %690 = dma.done.wait (%p1106_p9), %s233_s8, 128  }
  0x90   : > { %692 = vsyncadd (%p1106_p9), %s233_s8, 4294967168 }
  0x91   : > { %241 = sfence }
  0x92   : > { %s266_s7 = sld [smem:[#allocation4 + %s723_s30]]  ;;  %v267_v0 = vld [vmem:[%s227_s12] sm:$0xff]  ;;  %v268_v1 = vld [vmem:[%s236_s0] sm:$0xff]  ;;  %s264_s23 = scalar_lea.vmem [#allocation11], %s416_s13 }
  0x93   : > { %v269_v2 = vsub.f32 %v268_v1, %v267_v0  ;;  %s289_s15 = sshll.u32 %s264_s23, 4  ;;  %s420_s1 = sshll.u32 %s723_s30, 7  ;;  %s1010_s15 = int_to_ptr.vmem [resolvable:$true] %s289_s15 }
  0x94   : > { %s1015_s9 = scalar_lea.hbm %s1075_s4, %s420_s1  ;;  %s275_s24 = scalar_lea.sflag [#allocation6], %s995_s16 }
  0x95   : > { %s615_s19 = scalar_lea.vmem %s1010_s15, 128  ;;  %p1107_p3 = scmp.ne.s32.totalorder %s1095_s25, 0 }
  0x96   : > { %p616_p12 = scmp.ne.s32.totalorder %s1010_s15, %s615_s19  ;;  %s737_s30 = smov [#allocation11]  }
  0x97   : > { %s619_s17 = sshll.u32 %s737_s30, 4  ;;  %s620_s17 = int_to_ptr.vmem [resolvable:$false] %s619_s17 }
  0x98   : > { %v270_v3 = vstv %s266_s7  ;;  %p617_p7 = pnand %p616_p12, %p1107_p3  ;;  %s621_s13 = scalar_lea.vmem %s620_s17, 256 }
  0x99   : > { %v271_v4 = vmul.f32 %v270_v3, %v269_v2  ;;  %p622_p5 = scmp.lt.s32.totalorder %s1010_s15, %s620_s17  ;;  %p623_p6 = scmp.lt.s32.totalorder %s621_s13, %s615_s19 }
  0x9a   : > { %p618_p8 = pneg %p617_p7 }
  0x9b   : > { %v272_v5 = vadd.f32 %v271_v4, %v267_v0  ;;  %p624_p10 = por %p623_p6, %p622_p5 }
  0x9d   : > { %273 = vst [vmem:[%s264_s23] sm:$0xff] %v272_v5  ;;  %p625_p11 = pnand %p624_p10, %p618_p8 }
  0x9f   : > { %628 = shalt.err (!%p625_p11)
}
  0xa0   : > { %s629_s16 = scalar_lea.hbm %s1015_s9, 128  ;;  %s633_s11 = scalar_lea.hbm %s1075_s4, 256 }
  0xa1   : > { %p630_p13 = scmp.ne.s32.totalorder %s1015_s9, %s629_s16  ;;  %p634_p1 = scmp.lt.u32.totalorder %s1015_s9, %s1075_s4 }
  0xa2   : > { %p635_p0 = scmp.lt.u32.totalorder %s633_s11, %s629_s16  ;;  %p637_p12 = scmp.lt.u32.totalorder %s629_s16, %s1015_s9 }
  0xa3   : > { %p631_p4 = pnand %p630_p13, %p1107_p3 }
  0xa4   : > { %p636_p9 = por %p635_p0, %p634_p1 }
  0xa5   : > { %p632_p2 = pneg %p631_p4 }
  0xa6   : > { %p638_p7 = por %p637_p12, %p636_p9 }
  0xa8   : > { %p639_p8 = pnand %p638_p7, %p632_p2 }
  0xaa   : > { %642 = shalt.err (!%p639_p8)
}
  0xab   : > { %433 = dma.vmem_to_hbm [thread:$0]  (%p1107_p3), %s1010_s15, 128, %s1015_s9, %s275_s24  }
  0xac PF: > { %s301_s0 = sand.u32 1, %s711_s28   ;;  %p1108_p5 = scmp.ne.s32.totalorder %s1097_s14, 0 }
  0xad   : > { %p1109_p6 = scmp.ge.s32.totalorder %s731_s6, 2  ;;  %s302_s7 = scalar_lea.sflag [#allocation6], %s301_s0 }
  0xaf   : > { %p449_p10 = pnand %p1109_p6, %p1108_p5 }
  0xb1   : > { %694 = dma.done.wait (!%p449_p10), %s302_s7, 128  }
  0xb2   : > { %696 = vsyncadd (!%p449_p10), %s302_s7, 4294967168  ;;  %s28_s6 = sadd.s32 1, %s731_s6   ;;  %s1110_s23 = sld [smem:[#allocation19_spill]] }
  0xb3   : > { %p25_p11 = scmp.ge.s32.totalorder %s28_s6, 4   ;;  %s1111_s0 = sld [smem:[#allocation21_spill]] }
  0xb4   : > { %s1112_s15 = sld [smem:[#allocation20_spill]]  ;;  %s1113_s25 = smov %s703_s26 }
  0xb5   : > { %s1114_s26 = smov %s707_s27  ;;  %s1115_s27 = smov %s941_s20 }
  0xb6   : > { %s1116_s28 = smov %s715_s29  ;;  %s1118_s30 = smov %s727_s5 }
  0xb7   :  { %27 = sbr.rel (!%p25_p11) target bundleno = 23 (0x17), region = 95 }
  0xb8   : > { %s1117_s29 = smov %s1110_s23 }
  0xba   : > { %s1119_s5 = smov %s1112_s15 }
  0xbe   :  { %307 = vsyncpa [#allocation5], 1 }
  0xbf   :  { %309 = vsyncpa [#allocation5 + $0x1], 1 }
  0xc0   :  { %310 = vsyncpa [#allocation10], 1 }
  0xc1   :  { %312 = vsyncpa [#allocation10 + $0x1], 1 }
  0xc2   :  { %313 = vsyncpa [#allocation6], 1 }
  0xc3   :  { %315 = vsyncpa [#allocation6 + $0x1], 1 }
  0xc4   :  { %316 = vsyncpa [#allocation7], 1 }
  0xc5   :  { %318 = vsyncpa [#allocation7 + $0x1], 1 }

</bundles_post_ra>
